<compile_context>
chip_gen: v7x
topology: tpu7x:2x2x1
jax: 0.10.0
libtpu: 0.0.40
codegen_flags: <defaults>
</compile_context>

<pallas_src>
import functools
import math

import jax
import jax.numpy as jnp
from jax.experimental import pallas as pl
from jax.experimental.pallas import tpu as pltpu

_TWO_PI = 2.0 * math.pi


def _hash_u32(x):
    """'lowbias32' integer mixer — strong avalanche for sequential counters."""
    x = x ^ (x >> jnp.uint32(16))
    x = x * jnp.uint32(0x21F0AAAD)
    x = x ^ (x >> jnp.uint32(15))
    x = x * jnp.uint32(0x735A2D97)
    x = x ^ (x >> jnp.uint32(15))
    return x


def _bits_to_unit_float(bits):
    """uint32 random bits -> float32 uniform in [0, 1) (23 mantissa bits)."""
    mant = (bits >> jnp.uint32(9)) | jnp.uint32(0x3F800000)   # float in [1, 2)
    return jax.lax.bitcast_convert_type(mant, jnp.float32) - 1.0


def _pn_kernel(seed_ref, emb_ref, out_i_ref, out_j_ref, *,
               alpha, hidden, block_rows, block_cols):
    shape = emb_ref.shape  # (block_rows, block_cols)

    # Global element index of every slot in this tile -> an independent,
    # reproducible random stream per element.  No stateful PRNG, so tiles are
    # fully independent and the grid can be sharded "parallel".
    row = jax.lax.broadcasted_iota(jnp.int32, shape, 0) + pl.program_id(0) * block_rows
    col = jax.lax.broadcasted_iota(jnp.int32, shape, 1) + pl.program_id(1) * block_cols
    gidx = (row * hidden + col).astype(jnp.uint32)

    seed_u = seed_ref[0].astype(jnp.uint32)
    ctr = gidx * jnp.uint32(2) + seed_u * jnp.uint32(0x9E3779B9)

    # Two decorrelated uniforms per element.
    u1 = 1.0 - _bits_to_unit_float(_hash_u32(ctr))             # (0, 1]: log-safe
    u2 = _bits_to_unit_float(_hash_u32(ctr + jnp.uint32(1)))   # [0, 1)

    # Full Box-Muller pair: one log/sqrt + one cos + one sin gives BOTH
    # independent N(0,1) draws.  alpha folded into r once.
    r = jnp.float32(alpha) * jnp.sqrt(-2.0 * jnp.log(u1))
    theta = jnp.float32(_TWO_PI) * u2

    emb = emb_ref[...].astype(jnp.float32)
    out_i_ref[...] = (emb + r * jnp.cos(theta)).astype(out_i_ref.dtype)
    out_j_ref[...] = (emb + r * jnp.sin(theta)).astype(out_j_ref.dtype)


def _pick_block(dim, target, align):
    if dim <= target:
        return dim                      # full-extent block is always legal
    return max(align, (target // align) * align)


def gauss_plus_noise_pn_generator(emb, seed, alpha=1.0,
                                  block_rows_target=256,
                                  block_cols_target=1024):
    """Pallas equivalent of GaussPlusNoisePNGenerator.forward.

    emb: (B, D) float array.  Returns (emb + z_i, emb + z_j), z_* ~ alpha*N(0,1).
    """
    B, D = emb.shape
    bb = _pick_block(B, block_rows_target, 8)
    bd = _pick_block(D, block_cols_target, 128)
    grid = (pl.cdiv(B, bb), pl.cdiv(D, bd))

    seed_arr = jnp.asarray([seed], dtype=jnp.int32)

    kernel = functools.partial(
        _pn_kernel, alpha=float(alpha), hidden=D, block_rows=bb, block_cols=bd)

    out_shape = (jax.ShapeDtypeStruct((B, D), emb.dtype),
                 jax.ShapeDtypeStruct((B, D), emb.dtype))

    # index_maps receive the scalar-prefetch ref (seed) as a trailing arg.
    emb_spec = pl.BlockSpec((bb, bd), lambda i, j, seed: (i, j))
    out_spec = pl.BlockSpec((bb, bd), lambda i, j, seed: (i, j))

    grid_spec = pltpu.PrefetchScalarGridSpec(
        num_scalar_prefetch=1,          # seed lands in SMEM
        grid=grid,
        in_specs=[emb_spec],
        out_specs=(out_spec, out_spec),
    )

    return pl.pallas_call(
        kernel,
        out_shape=out_shape,
        grid_spec=grid_spec,
        compiler_params=pltpu.CompilerParams(
            # Stateless per-element RNG -> both axes safely parallel
            # (shards across v7x's two TensorCores; no-op on v5e/v6e).
            dimension_semantics=("parallel", "parallel"),
        ),
    )(seed_arr, emb)


if __name__ == "__main__":
    key = jax.random.PRNGKey(0)
    B, D = 8, 256
    emb = jax.random.normal(key, (B, D), dtype=jnp.float32)
    alpha = 1.0

    out_i, out_j = gauss_plus_noise_pn_generator(emb, seed=1234, alpha=alpha)
    out_i, out_j = jax.block_until_ready((out_i, out_j))

    # Sanity checks: shapes/dtypes match, outputs finite, the two noise draws
    # differ, and residual noise statistics look Gaussian-ish with std ~ alpha.
    assert out_i.shape == emb.shape and out_j.shape == emb.shape
    assert out_i.dtype == emb.dtype and out_j.dtype == emb.dtype
    assert bool(jnp.all(jnp.isfinite(out_i))) and bool(jnp.all(jnp.isfinite(out_j)))
    z_i = out_i - emb
    z_j = out_j - emb
    assert not bool(jnp.allclose(z_i, z_j)), "two noise draws must be independent"
    assert abs(float(jnp.mean(z_i))) < 0.2 and abs(float(jnp.mean(z_j))) < 0.2
    assert 0.7 < float(jnp.std(z_i)) < 1.3
    assert 0.7 < float(jnp.std(z_j)) < 1.3

    print("KERNEL_OK")
</pallas_src>

<mosaic_0001>
module attributes {stable_mosaic.version = 11 : i64} {
  func.func @_pn_kernel(%arg0: i32, %arg1: i32, %arg2: memref<1xi32, #tpu.memory_space<smem>>, %arg3: memref<8x256xf32, #tpu.memory_space<vmem>>, %arg4: memref<8x256xf32, #tpu.memory_space<vmem>>, %arg5: memref<8x256xf32, #tpu.memory_space<vmem>>) attributes {dimension_semantics = [#tpu.dimension_semantics<parallel>, #tpu.dimension_semantics<parallel>], iteration_bounds = array<i64: 1, 1>, scalar_prefetch = 1 : i64, scratch_operands = 0 : i64, tpu.core_type = #tpu.core_type<tc>, window_params = [{transform_indices = @transform_0, window_bounds = array<i64: 8, 256>}, {transform_indices = @transform_1, window_bounds = array<i64: 8, 256>}, {transform_indices = @transform_2, window_bounds = array<i64: 8, 256>}]} {
    %0 = tpu.iota {dimensions = array<i32: 0>} : vector<8x256xi32>
    %c8_i32 = arith.constant 8 : i32
    %1 = arith.muli %arg0, %c8_i32 : i32
    %2 = vector.broadcast %1 : i32 to vector<8x256xi32>
    %3 = arith.addi %0, %2 : vector<8x256xi32>
    %4 = tpu.iota {dimensions = array<i32: 1>} : vector<8x256xi32>
    %c256_i32 = arith.constant 256 : i32
    %5 = arith.muli %arg1, %c256_i32 : i32
    %6 = vector.broadcast %5 : i32 to vector<8x256xi32>
    %7 = arith.addi %4, %6 : vector<8x256xi32>
    %c256_i32_0 = arith.constant 256 : i32
    %8 = vector.broadcast %c256_i32_0 : i32 to vector<8x256xi32>
    %9 = arith.muli %3, %8 : vector<8x256xi32>
    %10 = arith.addi %9, %7 : vector<8x256xi32>
    %c0 = arith.constant 0 : index
    %11 = memref.load %arg2[%c0] : memref<1xi32, #tpu.memory_space<smem>>
    %c2_i32 = arith.constant 2 : i32
    %12 = vector.broadcast %c2_i32 : i32 to vector<8x256xi32>
    %13 = arith.muli %10, %12 : vector<8x256xi32>
    %c-1640531527_i32 = arith.constant -1640531527 : i32
    %14 = arith.muli %11, %c-1640531527_i32 : i32
    %15 = vector.broadcast %14 : i32 to vector<8x256xi32>
    %16 = arith.addi %13, %15 : vector<8x256xi32>
    %c16_i32 = arith.constant 16 : i32
    %17 = vector.broadcast %c16_i32 : i32 to vector<8x256xi32>
    %18 = arith.shrui %16, %17 : vector<8x256xi32>
    %19 = arith.xori %16, %18 : vector<8x256xi32>
    %c569420461_i32 = arith.constant 569420461 : i32
    %20 = vector.broadcast %c569420461_i32 : i32 to vector<8x256xi32>
    %21 = arith.muli %19, %20 : vector<8x256xi32>
    %c15_i32 = arith.constant 15 : i32
    %22 = vector.broadcast %c15_i32 : i32 to vector<8x256xi32>
    %23 = arith.shrui %21, %22 : vector<8x256xi32>
    %24 = arith.xori %21, %23 : vector<8x256xi32>
    %c1935289751_i32 = arith.constant 1935289751 : i32
    %25 = vector.broadcast %c1935289751_i32 : i32 to vector<8x256xi32>
    %26 = arith.muli %24, %25 : vector<8x256xi32>
    %c15_i32_1 = arith.constant 15 : i32
    %27 = vector.broadcast %c15_i32_1 : i32 to vector<8x256xi32>
    %28 = arith.shrui %26, %27 : vector<8x256xi32>
    %29 = arith.xori %26, %28 : vector<8x256xi32>
    %c9_i32 = arith.constant 9 : i32
    %30 = vector.broadcast %c9_i32 : i32 to vector<8x256xi32>
    %31 = arith.shrui %29, %30 : vector<8x256xi32>
    %c1065353216_i32 = arith.constant 1065353216 : i32
    %32 = vector.broadcast %c1065353216_i32 : i32 to vector<8x256xi32>
    %33 = arith.ori %31, %32 : vector<8x256xi32>
    %34 = tpu.bitcast %33 : vector<8x256xi32> -> vector<8x256xf32>
    %cst = arith.constant 1.000000e+00 : f32
    %35 = vector.broadcast %cst : f32 to vector<8x256xf32>
    %36 = arith.subf %34, %35 : vector<8x256xf32>
    %cst_2 = arith.constant 1.000000e+00 : f32
    %37 = vector.broadcast %cst_2 : f32 to vector<8x256xf32>
    %38 = arith.subf %37, %36 : vector<8x256xf32>
    %c1_i32 = arith.constant 1 : i32
    %39 = vector.broadcast %c1_i32 : i32 to vector<8x256xi32>
    %40 = arith.addi %16, %39 : vector<8x256xi32>
    %c16_i32_3 = arith.constant 16 : i32
    %41 = vector.broadcast %c16_i32_3 : i32 to vector<8x256xi32>
    %42 = arith.shrui %40, %41 : vector<8x256xi32>
    %43 = arith.xori %40, %42 : vector<8x256xi32>
    %c569420461_i32_4 = arith.constant 569420461 : i32
    %44 = vector.broadcast %c569420461_i32_4 : i32 to vector<8x256xi32>
    %45 = arith.muli %43, %44 : vector<8x256xi32>
    %c15_i32_5 = arith.constant 15 : i32
    %46 = vector.broadcast %c15_i32_5 : i32 to vector<8x256xi32>
    %47 = arith.shrui %45, %46 : vector<8x256xi32>
    %48 = arith.xori %45, %47 : vector<8x256xi32>
    %c1935289751_i32_6 = arith.constant 1935289751 : i32
    %49 = vector.broadcast %c1935289751_i32_6 : i32 to vector<8x256xi32>
    %50 = arith.muli %48, %49 : vector<8x256xi32>
    %c15_i32_7 = arith.constant 15 : i32
    %51 = vector.broadcast %c15_i32_7 : i32 to vector<8x256xi32>
    %52 = arith.shrui %50, %51 : vector<8x256xi32>
    %53 = arith.xori %50, %52 : vector<8x256xi32>
    %c9_i32_8 = arith.constant 9 : i32
    %54 = vector.broadcast %c9_i32_8 : i32 to vector<8x256xi32>
    %55 = arith.shrui %53, %54 : vector<8x256xi32>
    %c1065353216_i32_9 = arith.constant 1065353216 : i32
    %56 = vector.broadcast %c1065353216_i32_9 : i32 to vector<8x256xi32>
    %57 = arith.ori %55, %56 : vector<8x256xi32>
    %58 = tpu.bitcast %57 : vector<8x256xi32> -> vector<8x256xf32>
    %cst_10 = arith.constant 1.000000e+00 : f32
    %59 = vector.broadcast %cst_10 : f32 to vector<8x256xf32>
    %60 = arith.subf %58, %59 : vector<8x256xf32>
    %61 = math.log %38 : vector<8x256xf32>
    %cst_11 = arith.constant -2.000000e+00 : f32
    %62 = vector.broadcast %cst_11 : f32 to vector<8x256xf32>
    %63 = arith.mulf %62, %61 : vector<8x256xf32>
    %64 = math.sqrt %63 : vector<8x256xf32>
    %cst_12 = arith.constant 1.000000e+00 : f32
    %65 = vector.broadcast %cst_12 : f32 to vector<8x256xf32>
    %66 = arith.mulf %65, %64 : vector<8x256xf32>
    %cst_13 = arith.constant 6.28318548 : f32
    %67 = vector.broadcast %cst_13 : f32 to vector<8x256xf32>
    %68 = arith.mulf %67, %60 : vector<8x256xf32>
    %c0_14 = arith.constant 0 : index
    %c0_15 = arith.constant 0 : index
    %69 = vector.load %arg3[%c0_14, %c0_15] : memref<8x256xf32, #tpu.memory_space<vmem>>, vector<8x256xf32>
    %70 = math.cos %68 : vector<8x256xf32>
    %71 = arith.mulf %66, %70 : vector<8x256xf32>
    %72 = arith.addf %69, %71 : vector<8x256xf32>
    %c0_16 = arith.constant 0 : index
    %c0_17 = arith.constant 0 : index
    %73 = vector.load %arg4[%c0_16, %c0_17] : memref<8x256xf32, #tpu.memory_space<vmem>>, vector<8x256xf32>
    tpu.vector_store %arg4[%c0_16, %c0_17], %72 {strides = array<i32>} : memref<8x256xf32, #tpu.memory_space<vmem>>, vector<8x256xf32>,
    %74 = math.sin %68 : vector<8x256xf32>
    %75 = arith.mulf %66, %74 : vector<8x256xf32>
    %76 = arith.addf %69, %75 : vector<8x256xf32>
    %c0_18 = arith.constant 0 : index
    %c0_19 = arith.constant 0 : index
    %77 = vector.load %arg5[%c0_18, %c0_19] : memref<8x256xf32, #tpu.memory_space<vmem>>, vector<8x256xf32>
    tpu.vector_store %arg5[%c0_18, %c0_19], %76 {strides = array<i32>} : memref<8x256xf32, #tpu.memory_space<vmem>>, vector<8x256xf32>,
    return
  }
  func.func @transform_0(%arg0: i32, %arg1: i32, %arg2: memref<1xi32, #tpu.memory_space<smem>>) -> (i32, i32) {
    %c0_i32 = arith.constant 0 : i32
    return %arg0, %arg1 : i32, i32
  }
  func.func @transform_1(%arg0: i32, %arg1: i32, %arg2: memref<1xi32, #tpu.memory_space<smem>>) -> (i32, i32) {
    %c0_i32 = arith.constant 0 : i32
    return %arg0, %arg1 : i32, i32
  }
  func.func @transform_2(%arg0: i32, %arg1: i32, %arg2: memref<1xi32, #tpu.memory_space<smem>>) -> (i32, i32) {
    %c0_i32 = arith.constant 0 : i32
    return %arg0, %arg1 : i32, i32
  }
}

</mosaic_0001>

<bundles_post_ra>
// kernel: tpu_custom_call.1
= control target key start
LH: loop header
LB: loop body
LE: loop exit
PB: predicated region body
PF: predicated region fallthrough
CT: control target
= control target key end

     0   :  { %10 = vsyncpa [#allocation5], 0  ;;  %s877_s0 = inlined_call_operand.<no memory space> [shape: s32[1], index: 0, kind: input, shape index: {}]   ;;  %s878_s1 = inlined_call_operand.hbm [shape: f32[8,256], index: 1, kind: input, shape index: {}]   ;;  %s879_s2 = inlined_call_operand.hbm [shape: f32[8,256], index: 2, kind: output, shape index: {0}]   ;;  %s880_s3 = inlined_call_operand.hbm [shape: f32[8,256], index: 3, kind: output, shape index: {1}]  }
   0x1   :  { %11 = vsyncpa [#allocation6], 0 }
   0x2   :  { %12 = vsyncpa [#allocation9], 0  ;;  %s704_s12 = smov [#allocation4]   ;;  %s632_s16 = scalar_lea.hbm %s878_s1, 256 }
   0x3   :  { %s19_s13 = sshll.u32 %s704_s12, 4  ;;  %p633_p0 = scmp.ne.s32.totalorder %s878_s1, %s632_s16  ;;  %s20_s13 = int_to_ptr.vmem [resolvable:$true] %s19_s13 }
   0x4   :  { %p636_p1 = scmp.lt.u32.totalorder %s632_s16, %s878_s1 }
   0x6   :  { %p638_p2 = pnand %p636_p1, %p633_p0 }
   0x8   :  { %641 = shalt.err (!%p638_p2)
}
   0x9   :  { %s642_s21 = scalar_lea.vmem %s20_s13, 256  ;;  %p647_p4 = scmp.lt.s32.totalorder %s20_s13, %s20_s13 }
   0xa   :  { %p643_p3 = scmp.ne.s32.totalorder %s20_s13, %s642_s21  ;;  %p648_p5 = scmp.lt.s32.totalorder %s642_s21, %s642_s21 }
   0xc   :  { %p649_p6 = por %p648_p5, %p647_p4 }
   0xe   :  { %p650_p7 = pnand %p649_p6, %p643_p3 }
  0x10   :  { %653 = shalt.err (!%p650_p7)
}
  0x11   :  { %22 = dma.hbm_to_vmem [thread:$0]  %s878_s1, 256, %s20_s13, [#allocation5]  }
  0x12   :  { %698 = dma.done.wait [#allocation5], 256  }
  0x13   :  { %699 = vsyncadd [#allocation5], 4294967040  ;;  %v26_v0 = vlaneseq  ;;  %s44_s26 = smul.u32 2654435769, %s877_s0  ;;  %s711_s0 = smov [#allocation7]  }
  0x14   :  { %s556_s1 = sshll.u32 %s711_s0, 4  ;;  %s712_s27 = smov [#allocation8]   ;;  %s557_s1 = int_to_ptr.vmem [resolvable:$true] %s556_s1 }
  0x15   :  { %v27_v1 = vshrl.u32 %v26_v0, 7  ;;  %v32_v2 = vand.u32 127, %v26_v0  ;;  %v45_v7 = vstv %s44_s26  ;;  %s566_s28 = sshll.u32 %s712_s27, 4  ;;  %s654_s29 = scalar_lea.vmem %s557_s1, 256  ;;  %s567_s28 = int_to_ptr.vmem [resolvable:$true] %s566_s28 }
  0x16   :  { %p655_p8 = scmp.ne.s32.totalorder %s557_s1, %s654_s29  ;;  %p659_p9 = scmp.lt.s32.totalorder %s557_s1, %s557_s1 }
  0x17   :  { %v38_v3 = vmul.u32 256, %v27_v1  ;;  %v33_v4 = vadd.s32 128, %v32_v2  ;;  %p660_p10 = scmp.lt.s32.totalorder %s654_s29, %s654_s29 }
  0x19   :  { %v39_v5 = vadd.s32 %v38_v3, %v32_v2  ;;  %v40_v6 = vadd.s32 %v38_v3, %v33_v4  ;;  %p661_p11 = por %p660_p10, %p659_p9 }
  0x1b   :  { %v42_v8 = vmul.u32 2, %v39_v5  ;;  %v43_v9 = vmul.u32 2, %v40_v6  ;;  %v705_v5 = vmov 683565275   ;;  %p662_p12 = pnand %p661_p11, %p655_p8 }
  0x1d   :  { %v46_v10 = vadd.s32 %v45_v7, %v42_v8  ;;  %v47_v11 = vadd.s32 %v45_v7, %v43_v9  ;;  %v706_v7 = vmov 2475754826   ;;  %v707_v9 = vmov 2131351028  }
  0x1f   :  { %v74_v12 = vadd.s32 1, %v46_v10  ;;  %v75_v13 = vadd.s32 1, %v47_v11  ;;  %v48_v20 = vshrl.u32 %v46_v10, 16  ;;  %v49_v28 = vshrl.u32 %v47_v11, 16 }
  0x21   :  { %v76_v14 = vshrl.u32 %v74_v12, 16  ;;  %v77_v15 = vshrl.u32 %v75_v13, 16  ;;  %v50_v25 = vxor.u32 %v48_v20, %v46_v10  ;;  %v51_v34 = vxor.u32 %v49_v28, %v47_v11 }
  0x23   :  { %v78_v16 = vxor.u32 %v76_v14, %v74_v12  ;;  %v79_v17 = vxor.u32 %v77_v15, %v75_v13  ;;  %v52_v31 = vmul.u32 569420461, %v50_v25  ;;  %v53_v40 = vmul.u32 569420461, %v51_v34 }
  0x25   :  { %v80_v18 = vmul.u32 569420461, %v78_v16  ;;  %v81_v19 = vmul.u32 569420461, %v79_v17  ;;  %v54_v37 = vshrl.u32 %v52_v31, 15  ;;  %v55_v46 = vshrl.u32 %v53_v40, 15 }
  0x27   :  { %v82_v21 = vshrl.u32 %v80_v18, 15  ;;  %v83_v22 = vshrl.u32 %v81_v19, 15  ;;  %v56_v43 = vxor.u32 %v54_v37, %v52_v31  ;;  %v755_v52 = vxor.u32 %v55_v46, %v53_v40 }
  0x29   :  { %v84_v23 = vxor.u32 %v82_v21, %v80_v18  ;;  %v85_v24 = vxor.u32 %v83_v22, %v81_v19  ;;  %v58_v48 = vmul.u32 1935289751, %v56_v43  ;;  %v59_v59 = vmul.u32 1935289751, %v755_v52 }
  0x2a   :  { %v708_v18 = vmov 2102212464   ;;  %v709_v21 = vmov 920167782  }
  0x2b   :  { %v86_v26 = vmul.u32 1935289751, %v84_v23  ;;  %v87_v27 = vmul.u32 1935289751, %v85_v24  ;;  %v60_v55 = vshrl.u32 %v58_v48, 15  ;;  %v61_v3 = vshrl.u32 %v59_v59, 15 }
  0x2c   :  { %v710_v24 = vmov 1326507024  }
  0x2d   :  { %v88_v29 = vshrl.u32 %v86_v26, 15  ;;  %v89_v30 = vshrl.u32 %v87_v27, 15  ;;  %v62_v61 = vxor.u32 %v60_v55, %v58_v48 }
  0x2f   :  { %v90_v32 = vxor.u32 %v88_v29, %v86_v26  ;;  %v91_v33 = vxor.u32 %v89_v30, %v87_v27  ;;  %v64_v11 = vshrl.u32 %v62_v61, 9 }
  0x31   :  { %v92_v35 = vshrl.u32 %v90_v32, 9  ;;  %v93_v36 = vshrl.u32 %v91_v33, 9  ;;  %v66_v37 = vor.u32 1065353216, %v64_v11 }
  0x33   :  { %v94_v38 = vor.u32 1065353216, %v92_v35  ;;  %v95_v39 = vor.u32 1065353216, %v93_v36  ;;  %v579_v55 = vadd.f32 -1.0, %v66_v37 }
  0x35   :  { %v581_v41 = vadd.f32 -1.0, %v94_v38  ;;  %v582_v42 = vadd.f32 -1.0, %v95_v39 }
  0x37   :  { %v748_v44 = vmul.f32 6.2831855, %v581_v41  ;;  %v750_v45 = vmul.f32 6.2831855, %v582_v42 }
  0x39   :  { %v127_v47 = vand.u32 2139095040, %v748_v44  ;;  %v124_v49 = vand.u32 2147483647, %v748_v44  ;;  %v230_v50 = vand.u32 2139095040, %v750_v45  ;;  %v227_v13 = vand.u32 2147483647, %v750_v45 }
  0x3a   :  { %vm126_vm13 = vcmp.lt.s32.totalorder %v748_v44, 0 }
  0x3b   :  { %v128_v51 = vshrl.u32 %v127_v47, 23  ;;  %v231_v53 = vshrl.u32 %v230_v50, 23  ;;  %v131_v56 = vand.u32 8388607, %v124_v49  ;;  %vm125_vm14 = vcmp.le.f32.partialorder %v124_v49, 0.7853982 }
  0x3d   :  { %v583_v54 = vadd.s32 4294967169, %v128_v51  ;;  %v587_v57 = vadd.s32 4294967169, %v231_v53  ;;  %v132_v62 = vor.u32 8388608, %v131_v56  ;;  %v234_v53 = vand.u32 8388607, %v227_v13 }
  0x3f   :  { %v134_v58 = vadd.s32 1, %v583_v54  ;;  %v237_v60 = vadd.s32 1, %v587_v57  ;;  %v763_v12 = vshll.u32 %v132_v62, 8 }
  0x41   :  { %vm135_vm0 = vcmp.gt.s32.totalorder %v134_v58, 0  ;;  %vm238_vm1 = vcmp.gt.s32.totalorder %v237_v60, 0 }
  0x42   :  { %v136_v63 = vsel %vm135_vm0, %v134_v58, 0  ;;  %v239_v1 = vsel %vm238_vm1, %v237_v60, 0  ;;  %vm229_vm1 = vcmp.lt.s32.totalorder %v750_v45, 0 }
  0x43   :  { %v138_v0 = vand.u32 31, %v136_v63  ;;  %v137_v2 = vshrl.u32 %v136_v63, 5  ;;  %v241_v14 = vand.u32 31, %v239_v1  ;;  %v240_v57 = vshrl.u32 %v239_v1, 5 }
  0x45   :  { %v139_v4 = vsub.s32 32, %v138_v0  ;;  %v141_v6 = vshll.u32 %v705_v5, %v138_v0  ;;  %v144_v8 = vshll.u32 %v706_v7, %v138_v0  ;;  %v147_v10 = vshll.u32 %v707_v9, %v138_v0 }
  0x46   :  { %v150_v20 = vshll.u32 %v708_v18, %v138_v0  ;;  %v153_v23 = vshll.u32 %v709_v21, %v138_v0  ;;  %vm156_vm2 = vcmp.lt.s32.totalorder %v137_v2, 1  ;;  %vm157_vm3 = vcmp.lt.s32.totalorder %v137_v2, 2 }
  0x47   :  { %v140_v15 = vshrl.u32 %v705_v5, %v139_v4  ;;  %v142_v16 = vshrl.u32 %v706_v7, %v139_v4  ;;  %v145_v17 = vshrl.u32 %v707_v9, %v139_v4  ;;  %v148_v19 = vshrl.u32 %v708_v18, %v139_v4 }
  0x48   :  { %v151_v22 = vshrl.u32 %v709_v21, %v139_v4  ;;  %v154_v25 = vshrl.u32 %v710_v24, %v139_v4  ;;  %vm158_vm4 = vcmp.lt.s32.totalorder %v137_v2, 3  ;;  %vm159_vm5 = vcmp.lt.s32.totalorder %v137_v2, 4 }
  0x49   :  { %v143_v26 = vor.u32 %v142_v16, %v141_v6  ;;  %v146_v27 = vor.u32 %v145_v17, %v144_v8  ;;  %v149_v28 = vor.u32 %v148_v19, %v147_v10  ;;  %v242_v46 = vsub.s32 32, %v241_v14 }
  0x4a   :  { %v152_v29 = vor.u32 %v151_v22, %v150_v20  ;;  %v155_v30 = vor.u32 %v154_v25, %v153_v23  ;;  %v244_v54 = vshll.u32 %v705_v5, %v241_v14  ;;  %v247_v60 = vshll.u32 %v706_v7, %v241_v14 }
  0x4b   :  { %v160_v31 = vsel %vm156_vm2, %v140_v15, %v143_v26  ;;  %v164_v32 = vsel %vm156_vm2, %v143_v26, %v146_v27  ;;  %v168_v33 = vsel %vm156_vm2, %v146_v27, %v149_v28  ;;  %v161_v34 = vsel %vm159_vm5, %v149_v28, 2102212464 }
  0x4c   :  { %v165_v35 = vsel %vm159_vm5, %v152_v29, 920167782  ;;  %v169_v36 = vsel %vm159_vm5, %v155_v30, 1326507024  ;;  %v162_v38 = vsel %vm158_vm4, %v146_v27, %v161_v34  ;;  %v245_v58 = vshrl.u32 %v706_v7, %v242_v46 }
  0x4d   :  { %v166_v39 = vsel %vm158_vm4, %v149_v28, %v165_v35  ;;  %v170_v40 = vsel %vm158_vm4, %v152_v29, %v169_v36  ;;  %v163_v41 = vsel %vm157_vm3, %v160_v31, %v162_v38  ;;  %v248_v61 = vshrl.u32 %v707_v9, %v242_v46 }
  0x4e   :  { %v167_v42 = vsel %vm157_vm3, %v164_v32, %v166_v39  ;;  %v171_v43 = vsel %vm157_vm3, %v168_v33, %v170_v40  ;;  %v179_v56 = vmul.u32 %v763_v12, %v163_v41  ;;  %v250_v62 = vshll.u32 %v707_v9, %v241_v14 }
  0x4f   :  { %v768_v47 = vmul.u32.u64.low %v763_v12, %v171_v43  ;;  %v769_v48 = vmul.u32.u64.high %v763_v12, %v171_v43, %v768_v47  ;;  %v772_v50 = vmul.u32.u64.low %v763_v12, %v167_v42  ;;  %v773_v51 = vmul.u32.u64.high %v763_v12, %v167_v42, %v772_v50 }
  0x50   :  { %v251_v63 = vshrl.u32 %v708_v18, %v242_v46  ;;  %v63_v2 = vxor.u32 %v61_v3, %v59_v59  ;;  %v235_v4 = vor.u32 8388608, %v234_v53  ;;  %v246_v6 = vor.u32 %v245_v58, %v244_v54 }
  0x51   :  { %vm181_vm6 = vc.u32 %v769_v48, %v772_v50  ;;  %v182_v0 = vadd.s32 1, %v773_v51  ;;  %v249_v8 = vor.u32 %v248_v61, %v247_v60  ;;  %v253_v1 = vshll.u32 %v708_v18, %v241_v14 }
  0x52   :  { %v252_v10 = vor.u32 %v251_v63, %v250_v62  ;;  %v254_v12 = vshrl.u32 %v709_v21, %v242_v46  ;;  %v256_v7 = vshll.u32 %v709_v21, %v241_v14  ;;  %v72_v15 = vsub.f32 1.0, %v579_v55 }
  0x53   :  { %v183_v11 = vsel %vm181_vm6, %v182_v0, %v773_v51  ;;  %v257_v16 = vshrl.u32 %v710_v24, %v242_v46  ;;  %vm259_vm7 = vcmp.lt.s32.totalorder %v240_v57, 1  ;;  %v243_v17 = vshrl.u32 %v705_v5, %v242_v46 }
  0x54   :  { %v184_v9 = vadd.s32 %v183_v11, %v179_v56  ;;  %v255_v19 = vor.u32 %v254_v12, %v253_v1  ;;  %vm261_vm8 = vcmp.lt.s32.totalorder %v240_v57, 3  ;;  %vm262_vm9 = vcmp.lt.s32.totalorder %v240_v57, 4 }
  0x55   :  { %v258_v59 = vor.u32 %v257_v16, %v256_v7  ;;  %vm260_vm10 = vcmp.lt.s32.totalorder %v240_v57, 2  ;;  %v275_v3 = vshll.u32 %v235_v4, 8  ;;  %v264_v20 = vsel %vm262_vm9, %v252_v10, 2102212464 }
  0x56   :  { %v185_v52 = vadd.s32 536870912, %v184_v9  ;;  %v267_v22 = vsel %vm259_vm7, %v246_v6, %v249_v8  ;;  %v268_v23 = vsel %vm262_vm9, %v255_v19, 920167782  ;;  %v271_v18 = vsel %vm259_vm7, %v249_v8, %v252_v10 }
  0x57   :  { %v269_v21 = vsel %vm261_vm8, %v252_v10, %v268_v23  ;;  %v272_v24 = vsel %vm262_vm9, %v258_v59, 1326507024  ;;  %616 = vlog2.f32 %v72_v15  ;;  %v263_v5 = vsel %vm259_vm7, %v243_v17, %v246_v6 }
  0x58   :  { %v186_v14 = vshrl.u32 %v185_v52, 30  ;;  %v273_v25 = vsel %vm261_vm8, %v255_v19, %v272_v24  ;;  %v265_v27 = vsel %vm261_vm8, %v249_v8, %v264_v20  ;;  %v270_v28 = vsel %vm260_vm10, %v267_v22, %v269_v21 }
  0x59   :  { %v274_v29 = vsel %vm260_vm10, %v271_v18, %v273_v25  ;;  %v65_v30 = vshrl.u32 %v63_v2, 9  ;;  %v266_v34 = vsel %vm260_vm10, %v263_v5, %v265_v27  ;;  %v180_v54 = vadd.s32 %v772_v50, %v769_v48 }
  0x5a   :  { %v187_v26 = vshll.u32 %v186_v14, 30  ;;  %v795_v31 = vmul.u32.u64.low %v275_v3, %v274_v29  ;;  %v796_v32 = vmul.u32.u64.high %v275_v3, %v274_v29, %v795_v31  ;;  %v282_v40 = vmul.u32 %v275_v3, %v266_v34 }
  0x5b   :  { %v799_v35 = vmul.u32.u64.low %v275_v3, %v270_v28  ;;  %v800_v36 = vmul.u32.u64.high %v275_v3, %v270_v28, %v799_v35  ;;  %v67_v38 = vor.u32 1065353216, %v65_v30  ;;  %v210_v7 = vsub.s32 4, %v186_v14 }
  0x5c   :  { %v188_v33 = vsub.s32 %v184_v9, %v187_v26  ;;  %vm829_vm3 = vcmp.le.f32.partialorder %v227_v13, 0.7853982  ;;  %vm216_vm10 = vweird.f32 %v748_v44 }
  0x5d   :  { %vm284_vm11 = vc.u32 %v796_v32, %v799_v35  ;;  %v285_v41 = vadd.s32 1, %v800_v36  ;;  %v580_v46 = vadd.f32 -1.0, %v67_v38  ;;  %v211_v19 = vsel %vm126_vm13, %v210_v7, %v186_v14 }
  0x5e   :  { %v190_v37 = vsub.s32 0, %v188_v33  ;;  %v283_v20 = vadd.s32 %v799_v35, %v796_v32  ;;  %v213_v23 = vsel %vm125_vm14, 0, %v211_v19 }
  0x5f   :  { %v286_v47 = vsel %vm284_vm11, %v285_v41, %v800_v36  ;;  %v73_v58 = vsub.f32 1.0, %v580_v46  ;;  %v429_v14 = vadd.s32 3, %v213_v23  ;;  %v217_v32 = vand.u32 3, %v213_v23 }
  0x60   :  { %v584_v39 = vmin.u32 %v190_v37, %v188_v33  ;;  %v287_v53 = vadd.s32 %v286_v47, %v282_v40 }
  0x61   :  { %v617_v43 = vpop.eup %616  ;;  %618 = vlog2.f32 %v73_v58  ;;  %v430_v35 = vand.u32 3, %v429_v14  ;;  %vm222_vm4 = vcmp.eq.s32.totalorder %v217_v32, 2  ;;  %vm218_vm6 = vcmp.lt.s32.totalorder %v217_v32, 2 }
  0x62   :  { %v192_v42 = vclz %v584_v39  ;;  %v288_v55 = vadd.s32 536870912, %v287_v53  ;;  %v101_v56 = vmul.f32 0.6931472, %v617_v43  ;;  %vm219_vm7 = vcmp.eq.s32.totalorder %v217_v32, 0 }
  0x63   :  { %vm435_vm5 = vcmp.eq.s32.totalorder %v430_v35, 2  ;;  %vm432_vm8 = vcmp.eq.s32.totalorder %v430_v35, 0  ;;  %vm431_vm9 = vcmp.lt.s32.totalorder %v430_v35, 2 }
  0x64   :  { %v585_v51 = vadd.s32 4294967294, %v192_v42  ;;  %v807_v63 = vshrl.u32 %v288_v55, 30  ;;  %v810_v6 = vmul.f32 -2.0, %v101_v56 }
  0x66   :  { %vm586_vm12 = vcmp.lt.s32.totalorder %v585_v51, 0  ;;  %v290_v4 = vshll.u32 %v807_v63, 30  ;;  %620 = vrsqrt.f32 %v810_v6  ;;  %vm108_vm0 = vcmp.eq.f32.partialorder %v810_v6, inf }
  0x67   :  { %v195_v57 = vsel %vm586_vm12, 0, %v585_v51  ;;  %v313_v37 = vsub.s32 4, %v807_v63  ;;  %vm110_vm2 = vcmp.eq.f32.partialorder %v810_v6, 0.0  ;;  %v111_v38 = vand.u32 2147483648, %v810_v6 }
  0x68   :  { %v196_v60 = vsub.s32 32, %v195_v57  ;;  %v197_v61 = vshll.u32 %v188_v33, %v195_v57  ;;  %v200_v62 = vsub.s32 4294967266, %v195_v57  ;;  %v291_v48 = vsub.s32 %v287_v53, %v290_v4 }
  0x69   :  { %v314_v13 = vsel %vm229_vm1, %v313_v37, %v807_v63 }
  0x6a   :  { %v198_v0 = vshrl.u32 %v180_v54, %v196_v60  ;;  %v201_v2 = vadd.s32 127, %v200_v62  ;;  %v293_v1 = vsub.s32 0, %v291_v48  ;;  %v316_v62 = vsel %vm829_vm3, 0, %v314_v13 }
  0x6b   :  { %v619_v59 = vpop.eup %618 }
  0x6c   :  { %v199_v8 = vor.u32 %v198_v0, %v197_v61  ;;  %v202_v10 = vshll.u32 %v201_v2, 23  ;;  %v588_v15 = vmin.u32 %v293_v1, %v291_v48  ;;  %v103_v25 = vmul.f32 0.6931472, %v619_v59 }
  0x6e   :  { %v203_v50 = vor.u32 4788187, %v202_v10  ;;  %v206_v11 = vcvt.s32.f32 %v199_v8  ;;  %v295_v16 = vclz %v588_v15  ;;  %v819_v31 = vmul.f32 -2.0, %v103_v25 }
  0x6f   :  { %v533_v8 = vadd.s32 3, %v316_v62 }
  0x70   :  { %v204_v12 = vand.u32 2147483647, %v203_v50  ;;  %v589_v52 = vadd.s32 4294967294, %v295_v16  ;;  %v621_v26 = vpop.eup %620  ;;  %vm115_vm11 = vcmp.eq.f32.partialorder %v819_v31, inf  ;;  %vm117_vm12 = vcmp.eq.f32.partialorder %v819_v31, 0.0 }
  0x71   :  { %v107_v30 = vmul.f32 %v621_v26, %v810_v6  ;;  %v534_v1 = vand.u32 3, %v533_v8  ;;  %v118_v15 = vand.u32 2147483648, %v819_v31 }
  0x72   :  { %v207_v9 = vmul.f32 %v206_v11, %v204_v12  ;;  %vm590_vm15 = vcmp.lt.s32.totalorder %v589_v52, 0  ;;  %v320_v11 = vand.u32 3, %v316_v62 }
  0x73   :  { %v298_v18 = vsel %vm590_vm15, 0, %v589_v52  ;;  %v109_v41 = vsel %vm108_vm0, %v810_v6, %v107_v30  ;;  %vm536_vm0 = vcmp.eq.s32.totalorder %v534_v1, 0 }
  0x74   :  { %v208_v17 = vxor.u32 2147483648, %v207_v9  ;;  %v299_v21 = vsub.s32 32, %v298_v18  ;;  %v300_v24 = vshll.u32 %v291_v48, %v298_v18  ;;  %v303_v5 = vsub.s32 4294967266, %v298_v18 }
  0x75   :  { %v112_v55 = vsel %vm110_vm2, %v111_v38, %v109_v41  ;;  %vm322_vm15 = vcmp.eq.s32.totalorder %v320_v11, 0  ;;  %vm535_vm2 = vcmp.lt.s32.totalorder %v534_v1, 2 }
  0x76   :  { %v209_v3 = vsel %vm126_vm13, %v208_v17, %v207_v9  ;;  %v301_v49 = vshrl.u32 %v283_v20, %v299_v21  ;;  %v304_v27 = vadd.s32 127, %v303_v5  ;;  %vm325_vm13 = vcmp.eq.s32.totalorder %v320_v11, 2  ;;  %v123_v21 = vld [vmem:[#allocation4 + $0x8] sm:$0xff] }
  0x77   :  { %v212_v22 = vsel %vm125_vm14, %v748_v44, %v209_v3  ;;  %v122_v44 = vld [vmem:[#allocation4] sm:$0xff]  ;;  %vm539_vm14 = vcmp.eq.s32.totalorder %v534_v1, 2 }
  0x78   :  { %622 = vcosq.f32 %v212_v22  ;;  %v302_v28 = vor.u32 %v301_v49, %v300_v24  ;;  %v305_v29 = vshll.u32 %v304_v27, 23 }
  0x79   :  { %624 = vsinq.f32 %v212_v22 }
  0x7a   :  { %v306_v33 = vor.u32 4788187, %v305_v29  ;;  %v309_v34 = vcvt.s32.f32 %v302_v28  ;;  %626 = vrsqrt.f32 %v819_v31 }
  0x7c   :  { %v307_v36 = vand.u32 2147483647, %v306_v33 }
  0x7e   :  { %v310_v42 = vmul.f32 %v309_v34, %v307_v36 }
  0x80   :  { %v311_v51 = vxor.u32 2147483648, %v310_v42 }
  0x82   :  { %v623_v40 = vpop.eup %622  ;;  %v312_v57 = vsel %vm229_vm1, %v311_v51, %v310_v42  ;;  %vm321_vm1 = vcmp.lt.s32.totalorder %v320_v11, 2 }
  0x83   :  { %v625_v43 = vpop.eup %624  ;;  %v223_v46 = vxor.u32 2147483648, %v623_v40  ;;  %v315_v61 = vsel %vm829_vm3, %v750_v45, %v312_v57  ;;  %vm319_vm3 = vweird.f32 %v750_v45 }
  0x84   :  { %v220_v47 = vxor.u32 2147483648, %v625_v43  ;;  %628 = vcosq.f32 %v315_v61  ;;  %v627_v10 = vpop.eup %626 }
  0x85   :  { %v224_v53 = vsel %vm222_vm4, %v223_v46, %v625_v43  ;;  %v437_v54 = vsel %vm435_vm5, %v223_v46, %v625_v43  ;;  %630 = vsinq.f32 %v315_v61  ;;  %v114_v12 = vmul.f32 %v627_v10, %v819_v31 }
  0x86   :  { %v221_v56 = vsel %vm219_vm7, %v623_v40, %v220_v47  ;;  %v434_v58 = vsel %vm432_vm8, %v623_v40, %v220_v47 }
  0x87   :  { %v225_v60 = vsel %vm218_vm6, %v221_v56, %v224_v53  ;;  %v438_v63 = vsel %vm431_vm9, %v434_v58, %v437_v54  ;;  %v116_v16 = vsel %vm115_vm11, %v819_v31, %v114_v12 }
  0x88   :  { %v226_v0 = vsel %vm216_vm10, nan, %v225_v60  ;;  %v439_v2 = vsel %vm216_vm10, nan, %v438_v63  ;;  %v119_v3 = vsel %vm117_vm12, %v118_v15, %v116_v16 }
  0x89   :  { %v330_v4 = vmul.f32 %v226_v0, %v112_v55  ;;  %v544_v6 = vmul.f32 %v439_v2, %v112_v55 }
  0x8b   :  { %v332_v48 = vadd.f32 %v330_v4, %v122_v44  ;;  %v546_v50 = vadd.f32 %v544_v6, %v122_v44 }
  0x8d   :  { %334 = vst [vmem:[#allocation7] sm:$0xff] %v332_v48  ;;  %548 = vst [vmem:[#allocation8] sm:$0xff] %v546_v50 }
  0x8e   :  { %v629_v7 = vpop.eup %628 }
  0x8f   :  { %v631_v9 = vpop.eup %630  ;;  %v326_v17 = vxor.u32 2147483648, %v629_v7 }
  0x90   :  { %v323_v19 = vxor.u32 2147483648, %v631_v9 }
  0x91   :  { %v327_v52 = vsel %vm325_vm13, %v326_v17, %v631_v9  ;;  %v541_v59 = vsel %vm539_vm14, %v326_v17, %v631_v9 }
  0x92   :  { %v324_v20 = vsel %vm322_vm15, %v629_v7, %v323_v19  ;;  %v538_v22 = vsel %vm536_vm0, %v629_v7, %v323_v19 }
  0x93   :  { %v328_v23 = vsel %vm321_vm1, %v324_v20, %v327_v52  ;;  %v542_v18 = vsel %vm535_vm2, %v538_v22, %v541_v59 }
  0x94   :  { %v329_v24 = vsel %vm319_vm3, nan, %v328_v23  ;;  %v543_v5 = vsel %vm319_vm3, nan, %v542_v18 }
  0x95   :  { %v331_v25 = vmul.f32 %v329_v24, %v119_v3  ;;  %v545_v26 = vmul.f32 %v543_v5, %v119_v3 }
  0x97   :  { %v333_v49 = vadd.f32 %v331_v25, %v123_v21  ;;  %v547_v27 = vadd.f32 %v545_v26, %v123_v21 }
  0x99   :  { %335 = vst [vmem:[#allocation7 + $0x8] sm:$0xff] %v333_v49  ;;  %549 = vst [vmem:[#allocation8 + $0x8] sm:$0xff] %v547_v27 }
  0x9a   :  { %665 = shalt.err (!%p662_p12)
}
  0x9b   :  { %s666_s5 = scalar_lea.hbm %s879_s2, 256 }
  0x9c   :  { %p667_p13 = scmp.ne.s32.totalorder %s879_s2, %s666_s5  ;;  %p670_p0 = scmp.lt.u32.totalorder %s666_s5, %s879_s2 }
  0x9e   :  { %p672_p1 = pnand %p670_p0, %p667_p13 }
  0xa0   :  { %675 = shalt.err (!%p672_p1)
}
  0xa1   :  { %559 = dma.vmem_to_hbm [thread:$0]  %s557_s1, 256, %s879_s2, [#allocation6]  }
  0xa2   :  { %s676_s12 = scalar_lea.vmem %s567_s28, 256  ;;  %p681_p3 = scmp.lt.s32.totalorder %s567_s28, %s567_s28 }
  0xa3   :  { %p677_p2 = scmp.ne.s32.totalorder %s567_s28, %s676_s12  ;;  %p682_p4 = scmp.lt.s32.totalorder %s676_s12, %s676_s12 }
  0xa5   :  { %p683_p5 = por %p682_p4, %p681_p3 }
  0xa7   :  { %p684_p6 = pnand %p683_p5, %p677_p2 }
  0xa9   :  { %687 = shalt.err (!%p684_p6)
}
  0xaa   :  { %s688_s15 = scalar_lea.hbm %s880_s3, 256 }
  0xab   :  { %p689_p7 = scmp.ne.s32.totalorder %s880_s3, %s688_s15  ;;  %p692_p8 = scmp.lt.u32.totalorder %s688_s15, %s880_s3 }
  0xad   :  { %p694_p9 = pnand %p692_p8, %p689_p7 }
  0xaf   :  { %697 = shalt.err (!%p694_p9)
}
  0xb0   :  { %569 = dma.vmem_to_hbm [thread:$0]  %s567_s28, 256, %s880_s3, [#allocation9]  }
  0xb1   :  { %700 = dma.done.wait [#allocation6], 256  }
  0xb2   :  { %701 = vsyncadd [#allocation6], 4294967040 }
  0xb3   :  { %702 = dma.done.wait [#allocation9], 256  }
  0xb4   :  { %703 = vsyncadd [#allocation9], 4294967040 }
  0xb5   :  { %576 = vsyncpa [#allocation5], 1 }
  0xb6   :  { %577 = vsyncpa [#allocation6], 1 }
  0xb7   :  { %578 = vsyncpa [#allocation9], 1 }

</bundles_post_ra>
